<compile_context>
chip_gen: v7x
topology: tpu7x:2x2x1
jax: 0.10.0
libtpu: 0.0.40
codegen_flags: <defaults>
</compile_context>

<pallas_src>
import functools

import numpy as np
import jax
import jax.numpy as jnp
from jax.experimental import pallas as pl
from jax.experimental.pallas import tpu as pltpu

EPS = 1e-5


# --------------------------------------------------------------------------
# Pallas kernel: fused upsample(+pad) -> concat -> DoubleConv, batched lanes.
# --------------------------------------------------------------------------
def _up_double_conv_kernel(x2f_ref, x1f_ref, up2t_ref, masks_ref,
                           w1m_ref, g1_ref, b1_ref,
                           w2m_ref, g2_ref, b2_ref,
                           out_ref,
                           xcat_ref, rhs1_ref, rhs2_ref,
                           *, N, H, W, C1, C2):
    HW = H * W
    L = N * HW                      # batched lane count: lane = n*HW + hw
    Cin = C1 + C2
    Cmid_p = w1m_ref.shape[0]       # sublane-padded mid channels
    Cout_p = w2m_ref.shape[0]       # sublane-padded out channels

    # ---- bilinear 2x upsample (align_corners=True) + F.pad, ONE matmul ----
    # x1f rows are (n, c) planes of H1*W1 lanes -> the per-image interpolation
    # matrix applies row-wise, so one dot covers the whole batch.
    x1_up = jnp.dot(x1f_ref[...], up2t_ref[...],
                    preferred_element_type=jnp.float32)        # (N*C1, HW)
    x2f = x2f_ref[...]                                         # (N*C2, HW)

    # ---- torch.cat([x2, x1], dim=1) into batched-lane layout (Cin, N*HW) ----
    for n in range(N):
        xcat_ref[0:C2, n * HW:(n + 1) * HW] = x2f[n * C2:(n + 1) * C2, :]
        xcat_ref[C2:Cin, n * HW:(n + 1) * HW] = x1_up[n * C1:(n + 1) * C1, :]

    masks = masks_ref[...]                                     # (9, L) f32

    def build_im2col(x, C, rhs_ref):
        # x: (C, L) f32 planar block with lanes = n*HW + hw.
        # For each 3x3 tap: ONE lane roll of the whole block + border mask,
        # stored straight into the (9*C, L) im2col scratch (no concatenate).
        # Correctness invariant: |dy*W + dx| <= W+1 and every lane whose roll
        # wraps a row or image boundary is zeroed by the border mask.  This
        # only holds for a 3x3, dilation-1 kernel.
        t = 0
        for dy in (-1, 0, 1):
            for dx in (-1, 0, 1):
                s = dy * W + dx
                r = x if s == 0 else pltpu.roll(x, (-s) % L, axis=1)
                rhs_ref[t * C:(t + 1) * C, :] = r * masks[t:t + 1, :]
                t += 1

    def bn_relu(y, g, b):
        # Train-mode BatchNorm over (N, H, W): two-pass biased variance,
        # eps=1e-5, affine, then ReLU.  All f32.
        inv_cnt = 1.0 / float(L)
        mean = jnp.sum(y, axis=1, keepdims=True) * inv_cnt      # (C, 1)
        d = y - mean
        var = jnp.sum(d * d, axis=1, keepdims=True) * inv_cnt   # (C, 1)
        scale = g * jax.lax.rsqrt(var + EPS)
        return jnp.maximum(d * scale + b, 0.0)

    # ---- conv1: one batched MXU matmul (bf16 operands, f32 accum) ----
    build_im2col(xcat_ref[...], Cin, rhs1_ref)
    y1 = jnp.dot(w1m_ref[...], rhs1_ref[...].astype(jnp.bfloat16),
                 preferred_element_type=jnp.float32)           # (Cmid_p, L)
    y1 = bn_relu(y1, g1_ref[...], b1_ref[...])

    # ---- conv2 ----
    build_im2col(y1, Cmid_p, rhs2_ref)
    y2 = jnp.dot(w2m_ref[...], rhs2_ref[...].astype(jnp.bfloat16),
                 preferred_element_type=jnp.float32)           # (Cout_p, L)
    y2 = bn_relu(y2, g2_ref[...], b2_ref[...])

    # ---- lane-dense output (N*Cout_p, HW): direct slab stores, no concat ----
    for n in range(N):
        out_ref[n * Cout_p:(n + 1) * Cout_p, :] = y2[:, n * HW:(n + 1) * HW]


# --------------------------------------------------------------------------
# Host-side helpers (trace-time constants, free reshapes only).
# --------------------------------------------------------------------------
def _interp_pad_matrix(n_in, n_out, pad_before, pad_after):
    """Bilinear align_corners=True interpolation matrix with F.pad zero rows
    folded in.  Rows = padded output coords, cols = input coords."""
    total = pad_before + n_out + pad_after
    m = np.zeros((total, n_in), np.float32)
    for o in range(n_out):
        if n_out == 1 or n_in == 1:
            src = 0.0
        else:
            src = o * (n_in - 1) / (n_out - 1)
        i0 = min(max(int(np.floor(src)), 0), n_in - 1)
        i1 = min(i0 + 1, n_in - 1)
        f = src - i0
        m[pad_before + o, i0] += 1.0 - f
        m[pad_before + o, i1] += f
    return m


def _border_masks(N, H, W):
    """(9, N*H*W) zero-padding masks for the 3x3 taps in flat-lane space."""
    HW = H * W
    lane = np.arange(N * HW)
    hw = lane % HW
    hh = hw // W
    ww = hw % W
    masks = np.zeros((9, N * HW), np.float32)
    t = 0
    for dy in (-1, 0, 1):
        for dx in (-1, 0, 1):
            masks[t] = ((hh + dy >= 0) & (hh + dy < H) &
                        (ww + dx >= 0) & (ww + dx < W))
            t += 1
    return masks


def up_forward(x1_nchw, x2_nchw, params):
    """Equivalent of Up.forward(x1, x2); NCHW in / NCHW out like PyTorch."""
    w1, g1, b1, w2, g2, b2 = params                 # conv weights in HWIO
    N, C1, H1, W1 = x1_nchw.shape
    N2, C2, H, W = x2_nchw.shape
    assert N2 == N
    Cin = C1 + C2
    Cmid = w1.shape[3]
    Cout = w2.shape[3]
    HW = H * W
    L = N * HW
    SUB = 8                                        # f32 sublane tile
    Cmid_p = -(-Cmid // SUB) * SUB
    Cout_p = -(-Cout // SUB) * SUB

    # Static fused upsample(2x, align_corners=True) + F.pad matrix (per image).
    diff_y = H - 2 * H1
    diff_x = W - 2 * W1
    # TODO(synk): negative diffs (cropping) not handled; U-Net's Up always pads.
    assert diff_y >= 0 and diff_x >= 0
    mh = _interp_pad_matrix(H1, 2 * H1, diff_y // 2, diff_y - diff_y // 2)
    mw = _interp_pad_matrix(W1, 2 * W1, diff_x // 2, diff_x - diff_x // 2)
    up2t = jnp.asarray(np.kron(mh, mw).T, dtype=jnp.float32)   # (H1*W1, HW)

    masks = jnp.asarray(_border_masks(N, H, W))                # (9, N*HW)

    # Planar views (rows = n*C + c, lanes = h*W + w): free reshapes of NCHW.
    x2f = x2_nchw.reshape(N * C2, HW).astype(jnp.float32)
    x1f = x1_nchw.reshape(N * C1, H1 * W1).astype(jnp.float32)

    # HWIO -> (Cout_pad, tap*Cin_pad + cin), bf16 for the MXU; zero padding for
    # sublane-aligned channel counts.
    def pack_w(w, ci_pad, co_pad):
        kh, kw, ci, co = w.shape
        wp = jnp.pad(w, ((0, 0), (0, 0), (0, ci_pad - ci), (0, co_pad - co)))
        return (jnp.transpose(wp, (3, 0, 1, 2))
                .reshape(co_pad, kh * kw * ci_pad).astype(jnp.bfloat16))

    def pad_vec(v, cp):
        return jnp.pad(v, (0, cp - v.shape[0])).reshape(cp, 1).astype(jnp.float32)

    w1m = pack_w(w1, Cin, Cmid_p)        # (Cmid_p, 9*Cin)
    w2m = pack_w(w2, Cmid_p, Cout_p)     # (Cout_p, 9*Cmid_p)
    g1c, b1c = pad_vec(g1, Cmid_p), pad_vec(b1, Cmid_p)
    g2c, b2c = pad_vec(g2, Cout_p), pad_vec(b2, Cout_p)

    vmem = pl.BlockSpec(memory_space=pltpu.MemorySpace.VMEM)
    kernel = functools.partial(_up_double_conv_kernel,
                               N=N, H=H, W=W, C1=C1, C2=C2)
    out = pl.pallas_call(
        kernel,
        out_shape=jax.ShapeDtypeStruct((N * Cout_p, HW), jnp.float32),
        in_specs=[vmem] * 10,
        out_specs=vmem,
        scratch_shapes=[
            pltpu.VMEM((Cin, L), jnp.float32),          # concat(x2, x1_up)
            pltpu.VMEM((9 * Cin, L), jnp.float32),      # im2col RHS, conv1
            pltpu.VMEM((9 * Cmid_p, L), jnp.float32),   # im2col RHS, conv2
        ],
    )(x2f, x1f, up2t, masks, w1m, g1c, b1c, w2m, g2c, b2c)

    # (N*Cout_p, HW) -> (N, Cout, H, W): free reshape + channel slice.
    return out.reshape(N, Cout_p, H, W)[:, :Cout]


# --------------------------------------------------------------------------
# Pure-JAX reference (independent path: gather upsample + lax.conv + BN, f32).
# --------------------------------------------------------------------------
def _bilinear_upsample_x2_align_corners(x):  # x: (N, H, W, C)
    N, H, W, C = x.shape
    Ho, Wo = 2 * H, 2 * W

    def coords(n_in, n_out):
        if n_in == 1 or n_out == 1:
            src = jnp.zeros((n_out,), jnp.float32)
        else:
            src = jnp.arange(n_out, dtype=jnp.float32) * (n_in - 1) / (n_out - 1)
        i0 = jnp.clip(jnp.floor(src).astype(jnp.int32), 0, n_in - 1)
        i1 = jnp.clip(i0 + 1, 0, n_in - 1)
        frac = src - i0.astype(jnp.float32)
        return i0, i1, frac

    h0, h1, fh = coords(H, Ho)
    w0, w1, fw = coords(W, Wo)
    xh = (x[:, h0, :, :] * (1.0 - fh)[None, :, None, None]
          + x[:, h1, :, :] * fh[None, :, None, None])
    out = (xh[:, :, w0, :] * (1.0 - fw)[None, None, :, None]
           + xh[:, :, w1, :] * fw[None, None, :, None])
    return out


def _ref_double_conv(x_nhwc, w1, g1, b1, w2, g2, b2):
    def conv_bn_relu(x, w, g, b):
        dn = jax.lax.conv_dimension_numbers(x.shape, w.shape,
                                            ('NHWC', 'HWIO', 'NHWC'))
        y = jax.lax.conv_general_dilated(x, w, (1, 1), 'SAME',
                                         dimension_numbers=dn)
        mean = jnp.mean(y, axis=(0, 1, 2))
        var = jnp.mean((y - mean) ** 2, axis=(0, 1, 2))
        y = (y - mean) * (g * jax.lax.rsqrt(var + EPS)) + b
        return jnp.maximum(y, 0.0)

    return conv_bn_relu(conv_bn_relu(x_nhwc, w1, g1, b1), w2, g2, b2)


def _ref_up_forward(x1_nchw, x2_nchw, params):
    x1 = jnp.transpose(x1_nchw, (0, 2, 3, 1))
    x2 = jnp.transpose(x2_nchw, (0, 2, 3, 1))
    x1 = _bilinear_upsample_x2_align_corners(x1)
    dy = x2.shape[1] - x1.shape[1]
    dx = x2.shape[2] - x1.shape[2]
    x1 = jnp.pad(x1, ((0, 0), (dy // 2, dy - dy // 2),
                      (dx // 2, dx - dx // 2), (0, 0)))
    x = jnp.concatenate([x2, x1], axis=-1)
    return jnp.transpose(_ref_double_conv(x, *params), (0, 3, 1, 2))


if __name__ == "__main__":
    # Up(in_channels=8, out_channels=4, bilinear=True) -> mid_channels = 4
    in_ch, out_ch = 8, 4
    mid_ch = in_ch // 2
    N = 2

    key = jax.random.PRNGKey(0)
    ks = jax.random.split(key, 8)
    w1 = 0.2 * jax.random.normal(ks[0], (3, 3, in_ch, mid_ch), jnp.float32)  # HWIO
    g1 = 1.0 + 0.1 * jax.random.normal(ks[1], (mid_ch,), jnp.float32)
    b1 = 0.1 * jax.random.normal(ks[2], (mid_ch,), jnp.float32)
    w2 = 0.2 * jax.random.normal(ks[3], (3, 3, mid_ch, out_ch), jnp.float32)
    g2 = 1.0 + 0.1 * jax.random.normal(ks[4], (out_ch,), jnp.float32)
    b2 = 0.1 * jax.random.normal(ks[5], (out_ch,), jnp.float32)
    params = (w1, g1, b1, w2, g2, b2)

    # x1: decoder feature (NCHW), x2: skip connection (NCHW, 2x spatial)
    x1 = jax.random.normal(ks[6], (N, in_ch // 2, 8, 8), jnp.float32)
    x2 = jax.random.normal(ks[7], (N, in_ch // 2, 16, 16), jnp.float32)

    out = jax.jit(up_forward)(x1, x2, params)
    out = jax.block_until_ready(out)
    assert out.shape == (N, out_ch, 16, 16), out.shape

    ref = _ref_up_forward(x1, x2, params)
    err = float(jnp.max(jnp.abs(out - ref)))
    # Conv matmul operands are bf16 (per perf review); two convs + BatchNorm
    # amplify the ~2^-9 operand rounding, so the tolerance is bf16-scale.
    assert jnp.allclose(out, ref, rtol=1e-1, atol=1e-1), err
    print("KERNEL_OK")
</pallas_src>

<mosaic_0001>
module attributes {stable_mosaic.version = 11 : i64} {
  func.func @_up_double_conv_kernel(%arg0: memref<8x256xf32, #tpu.memory_space<vmem>>, %arg1: memref<8x64xf32, #tpu.memory_space<vmem>>, %arg2: memref<64x256xf32, #tpu.memory_space<vmem>>, %arg3: memref<9x512xf32, #tpu.memory_space<vmem>>, %arg4: memref<8x72xbf16, #tpu.memory_space<vmem>>, %arg5: memref<8x1xf32, #tpu.memory_space<vmem>>, %arg6: memref<8x1xf32, #tpu.memory_space<vmem>>, %arg7: memref<8x72xbf16, #tpu.memory_space<vmem>>, %arg8: memref<8x1xf32, #tpu.memory_space<vmem>>, %arg9: memref<8x1xf32, #tpu.memory_space<vmem>>, %arg10: memref<16x256xf32, #tpu.memory_space<vmem>>, %arg11: memref<8x512xf32, #tpu.memory_space<vmem>>, %arg12: memref<72x512xf32, #tpu.memory_space<vmem>>, %arg13: memref<72x512xf32, #tpu.memory_space<vmem>>) attributes {dimension_semantics = [], scalar_prefetch = 0 : i64, scratch_operands = 3 : i64, tpu.core_type = #tpu.core_type<tc>} {
    %c0 = arith.constant 0 : index
    %c0_0 = arith.constant 0 : index
    %0 = vector.load %arg1[%c0, %c0_0] : memref<8x64xf32, #tpu.memory_space<vmem>>, vector<8x64xf32>
    %c0_1 = arith.constant 0 : index
    %c0_2 = arith.constant 0 : index
    %1 = vector.load %arg2[%c0_1, %c0_2] : memref<64x256xf32, #tpu.memory_space<vmem>>, vector<64x256xf32>
    %cst = arith.constant dense<0.000000e+00> : vector<8x256xf32>
    %2 = tpu.matmul %0, %1, %cst {dimension_numbers = #tpu.dot_dimension_numbers<[1], [0], [0], [1], [0, 0, 1, 1], [], []>} : vector<8x64xf32>, vector<64x256xf32>, vector<8x256xf32> -> vector<8x256xf32>
    %c0_3 = arith.constant 0 : index
    %c0_4 = arith.constant 0 : index
    %3 = vector.load %arg0[%c0_3, %c0_4] : memref<8x256xf32, #tpu.memory_space<vmem>>, vector<8x256xf32>
    %4 = vector.extract_strided_slice %3 {offsets = [0, 0], sizes = [4, 256], strides = [1, 1]} : vector<8x256xf32> to vector<4x256xf32>
    %c0_5 = arith.constant 0 : index
    %c0_6 = arith.constant 0 : index
    %5 = vector.load %arg11[%c0_5, %c0_6] : memref<8x512xf32, #tpu.memory_space<vmem>>, vector<4x256xf32>
    tpu.vector_store %arg11[%c0_5, %c0_6], %4 {strides = array<i32>} : memref<8x512xf32, #tpu.memory_space<vmem>>, vector<4x256xf32>,
    %6 = vector.extract_strided_slice %2 {offsets = [0, 0], sizes = [4, 256], strides = [1, 1]} : vector<8x256xf32> to vector<4x256xf32>
    %c4 = arith.constant 4 : index
    %c0_7 = arith.constant 0 : index
    %7 = vector.load %arg11[%c4, %c0_7] : memref<8x512xf32, #tpu.memory_space<vmem>>, vector<4x256xf32>
    tpu.vector_store %arg11[%c4, %c0_7], %6 {strides = array<i32>} : memref<8x512xf32, #tpu.memory_space<vmem>>, vector<4x256xf32>,
    %8 = vector.extract_strided_slice %3 {offsets = [4, 0], sizes = [4, 256], strides = [1, 1]} : vector<8x256xf32> to vector<4x256xf32>
    %c0_8 = arith.constant 0 : index
    %c256 = arith.constant 256 : index
    %9 = vector.load %arg11[%c0_8, %c256] : memref<8x512xf32, #tpu.memory_space<vmem>>, vector<4x256xf32>
    tpu.vector_store %arg11[%c0_8, %c256], %8 {strides = array<i32>} : memref<8x512xf32, #tpu.memory_space<vmem>>, vector<4x256xf32>,
    %10 = vector.extract_strided_slice %2 {offsets = [4, 0], sizes = [4, 256], strides = [1, 1]} : vector<8x256xf32> to vector<4x256xf32>
    %c4_9 = arith.constant 4 : index
    %c256_10 = arith.constant 256 : index
    %11 = vector.load %arg11[%c4_9, %c256_10] : memref<8x512xf32, #tpu.memory_space<vmem>>, vector<4x256xf32>
    tpu.vector_store %arg11[%c4_9, %c256_10], %10 {strides = array<i32>} : memref<8x512xf32, #tpu.memory_space<vmem>>, vector<4x256xf32>,
    %c0_11 = arith.constant 0 : index
    %c0_12 = arith.constant 0 : index
    %12 = vector.load %arg3[%c0_11, %c0_12] : memref<9x512xf32, #tpu.memory_space<vmem>>, vector<9x512xf32>
    %c0_13 = arith.constant 0 : index
    %c0_14 = arith.constant 0 : index
    %13 = vector.load %arg11[%c0_13, %c0_14] : memref<8x512xf32, #tpu.memory_space<vmem>>, vector<8x512xf32>
    %c17_i32 = arith.constant 17 : i32
    %14 = tpu.dynamic_rotate %13 by %c17_i32 dim 1 : vector<8x512xf32>, i32 -> vector<8x512xf32>
    %15 = vector.extract_strided_slice %12 {offsets = [0, 0], sizes = [1, 512], strides = [1, 1]} : vector<9x512xf32> to vector<1x512xf32>
    %16 = vector.broadcast %15 : vector<1x512xf32> to vector<8x512xf32>
    %17 = arith.mulf %14, %16 : vector<8x512xf32>
    %c0_15 = arith.constant 0 : index
    %c0_16 = arith.constant 0 : index
    %18 = vector.load %arg12[%c0_15, %c0_16] : memref<72x512xf32, #tpu.memory_space<vmem>>, vector<8x512xf32>
    tpu.vector_store %arg12[%c0_15, %c0_16], %17 {strides = array<i32>} : memref<72x512xf32, #tpu.memory_space<vmem>>, vector<8x512xf32>,
    %c16_i32 = arith.constant 16 : i32
    %19 = tpu.dynamic_rotate %13 by %c16_i32 dim 1 : vector<8x512xf32>, i32 -> vector<8x512xf32>
    %20 = vector.extract_strided_slice %12 {offsets = [1, 0], sizes = [1, 512], strides = [1, 1]} : vector<9x512xf32> to vector<1x512xf32>
    %21 = vector.broadcast %20 : vector<1x512xf32> to vector<8x512xf32>
    %22 = arith.mulf %19, %21 : vector<8x512xf32>
    %c8 = arith.constant 8 : index
    %c0_17 = arith.constant 0 : index
    %23 = vector.load %arg12[%c8, %c0_17] : memref<72x512xf32, #tpu.memory_space<vmem>>, vector<8x512xf32>
    tpu.vector_store %arg12[%c8, %c0_17], %22 {strides = array<i32>} : memref<72x512xf32, #tpu.memory_space<vmem>>, vector<8x512xf32>,
    %c15_i32 = arith.constant 15 : i32
    %24 = tpu.dynamic_rotate %13 by %c15_i32 dim 1 : vector<8x512xf32>, i32 -> vector<8x512xf32>
    %25 = vector.extract_strided_slice %12 {offsets = [2, 0], sizes = [1, 512], strides = [1, 1]} : vector<9x512xf32> to vector<1x512xf32>
    %26 = vector.broadcast %25 : vector<1x512xf32> to vector<8x512xf32>
    %27 = arith.mulf %24, %26 : vector<8x512xf32>
    %c16 = arith.constant 16 : index
    %c0_18 = arith.constant 0 : index
    %28 = vector.load %arg12[%c16, %c0_18] : memref<72x512xf32, #tpu.memory_space<vmem>>, vector<8x512xf32>
    tpu.vector_store %arg12[%c16, %c0_18], %27 {strides = array<i32>} : memref<72x512xf32, #tpu.memory_space<vmem>>, vector<8x512xf32>,
    %c1_i32 = arith.constant 1 : i32
    %29 = tpu.dynamic_rotate %13 by %c1_i32 dim 1 : vector<8x512xf32>, i32 -> vector<8x512xf32>
    %30 = vector.extract_strided_slice %12 {offsets = [3, 0], sizes = [1, 512], strides = [1, 1]} : vector<9x512xf32> to vector<1x512xf32>
    %31 = vector.broadcast %30 : vector<1x512xf32> to vector<8x512xf32>
    %32 = arith.mulf %29, %31 : vector<8x512xf32>
    %c24 = arith.constant 24 : index
    %c0_19 = arith.constant 0 : index
    %33 = vector.load %arg12[%c24, %c0_19] : memref<72x512xf32, #tpu.memory_space<vmem>>, vector<8x512xf32>
    tpu.vector_store %arg12[%c24, %c0_19], %32 {strides = array<i32>} : memref<72x512xf32, #tpu.memory_space<vmem>>, vector<8x512xf32>,
    %34 = vector.extract_strided_slice %12 {offsets = [4, 0], sizes = [1, 512], strides = [1, 1]} : vector<9x512xf32> to vector<1x512xf32>
    %35 = vector.broadcast %34 : vector<1x512xf32> to vector<8x512xf32>
    %36 = arith.mulf %13, %35 : vector<8x512xf32>
    %c32 = arith.constant 32 : index
    %c0_20 = arith.constant 0 : index
    %37 = vector.load %arg12[%c32, %c0_20] : memref<72x512xf32, #tpu.memory_space<vmem>>, vector<8x512xf32>
    tpu.vector_store %arg12[%c32, %c0_20], %36 {strides = array<i32>} : memref<72x512xf32, #tpu.memory_space<vmem>>, vector<8x512xf32>,
    %c511_i32 = arith.constant 511 : i32
    %38 = tpu.dynamic_rotate %13 by %c511_i32 dim 1 : vector<8x512xf32>, i32 -> vector<8x512xf32>
    %39 = vector.extract_strided_slice %12 {offsets = [5, 0], sizes = [1, 512], strides = [1, 1]} : vector<9x512xf32> to vector<1x512xf32>
    %40 = vector.broadcast %39 : vector<1x512xf32> to vector<8x512xf32>
    %41 = arith.mulf %38, %40 : vector<8x512xf32>
    %c40 = arith.constant 40 : index
    %c0_21 = arith.constant 0 : index
    %42 = vector.load %arg12[%c40, %c0_21] : memref<72x512xf32, #tpu.memory_space<vmem>>, vector<8x512xf32>
    tpu.vector_store %arg12[%c40, %c0_21], %41 {strides = array<i32>} : memref<72x512xf32, #tpu.memory_space<vmem>>, vector<8x512xf32>,
    %c497_i32 = arith.constant 497 : i32
    %43 = tpu.dynamic_rotate %13 by %c497_i32 dim 1 : vector<8x512xf32>, i32 -> vector<8x512xf32>
    %44 = vector.extract_strided_slice %12 {offsets = [6, 0], sizes = [1, 512], strides = [1, 1]} : vector<9x512xf32> to vector<1x512xf32>
    %45 = vector.broadcast %44 : vector<1x512xf32> to vector<8x512xf32>
    %46 = arith.mulf %43, %45 : vector<8x512xf32>
    %c48 = arith.constant 48 : index
    %c0_22 = arith.constant 0 : index
    %47 = vector.load %arg12[%c48, %c0_22] : memref<72x512xf32, #tpu.memory_space<vmem>>, vector<8x512xf32>
    tpu.vector_store %arg12[%c48, %c0_22], %46 {strides = array<i32>} : memref<72x512xf32, #tpu.memory_space<vmem>>, vector<8x512xf32>,
    %c496_i32 = arith.constant 496 : i32
    %48 = tpu.dynamic_rotate %13 by %c496_i32 dim 1 : vector<8x512xf32>, i32 -> vector<8x512xf32>
    %49 = vector.extract_strided_slice %12 {offsets = [7, 0], sizes = [1, 512], strides = [1, 1]} : vector<9x512xf32> to vector<1x512xf32>
    %50 = vector.broadcast %49 : vector<1x512xf32> to vector<8x512xf32>
    %51 = arith.mulf %48, %50 : vector<8x512xf32>
    %c56 = arith.constant 56 : index
    %c0_23 = arith.constant 0 : index
    %52 = vector.load %arg12[%c56, %c0_23] : memref<72x512xf32, #tpu.memory_space<vmem>>, vector<8x512xf32>
    tpu.vector_store %arg12[%c56, %c0_23], %51 {strides = array<i32>} : memref<72x512xf32, #tpu.memory_space<vmem>>, vector<8x512xf32>,
    %c495_i32 = arith.constant 495 : i32
    %53 = tpu.dynamic_rotate %13 by %c495_i32 dim 1 : vector<8x512xf32>, i32 -> vector<8x512xf32>
    %54 = vector.extract_strided_slice %12 {offsets = [8, 0], sizes = [1, 512], strides = [1, 1]} : vector<9x512xf32> to vector<1x512xf32>
    %55 = vector.broadcast %54 : vector<1x512xf32> to vector<8x512xf32>
    %56 = arith.mulf %53, %55 : vector<8x512xf32>
    %c64 = arith.constant 64 : index
    %c0_24 = arith.constant 0 : index
    %57 = vector.load %arg12[%c64, %c0_24] : memref<72x512xf32, #tpu.memory_space<vmem>>, vector<8x512xf32>
    tpu.vector_store %arg12[%c64, %c0_24], %56 {strides = array<i32>} : memref<72x512xf32, #tpu.memory_space<vmem>>, vector<8x512xf32>,
    %c0_25 = arith.constant 0 : index
    %c0_26 = arith.constant 0 : index
    %58 = vector.load %arg4[%c0_25, %c0_26] : memref<8x72xbf16, #tpu.memory_space<vmem>>, vector<8x72xbf16>
    %c0_27 = arith.constant 0 : index
    %c0_28 = arith.constant 0 : index
    %59 = vector.load %arg12[%c0_27, %c0_28] : memref<72x512xf32, #tpu.memory_space<vmem>>, vector<72x512xf32>
    %60 = arith.truncf %59 : vector<72x512xf32> to vector<72x512xbf16>
    %cst_29 = arith.constant dense<0.000000e+00> : vector<8x512xf32>
    %61 = tpu.matmul %58, %60, %cst_29 {dimension_numbers = #tpu.dot_dimension_numbers<[1], [0], [0], [1], [0, 0, 1, 1], [], []>} : vector<8x72xbf16>, vector<72x512xbf16>, vector<8x512xf32> -> vector<8x512xf32>
    %c0_30 = arith.constant 0 : index
    %c0_31 = arith.constant 0 : index
    %62 = vector.load %arg5[%c0_30, %c0_31] : memref<8x1xf32, #tpu.memory_space<vmem>>, vector<8x1xf32>
    %c0_32 = arith.constant 0 : index
    %c0_33 = arith.constant 0 : index
    %63 = vector.load %arg6[%c0_32, %c0_33] : memref<8x1xf32, #tpu.memory_space<vmem>>, vector<8x1xf32>
    %cst_34 = arith.constant dense<0.000000e+00> : vector<8xf32>
    %64 = vector.multi_reduction <add>, %61, %cst_34 [1] : vector<8x512xf32> to vector<8xf32>
    %65 = vector.shape_cast %64 : vector<8xf32> to vector<8x1xf32>
    %cst_35 = arith.constant 0.001953125 : f32
    %66 = vector.broadcast %cst_35 : f32 to vector<8x1xf32>
    %67 = arith.mulf %65, %66 : vector<8x1xf32>
    %68 = vector.broadcast %67 : vector<8x1xf32> to vector<8x512xf32>
    %69 = arith.subf %61, %68 : vector<8x512xf32>
    %70 = arith.mulf %69, %69 : vector<8x512xf32>
    %cst_36 = arith.constant dense<0.000000e+00> : vector<8xf32>
    %71 = vector.multi_reduction <add>, %70, %cst_36 [1] : vector<8x512xf32> to vector<8xf32>
    %72 = vector.shape_cast %71 : vector<8xf32> to vector<8x1xf32>
    %cst_37 = arith.constant 0.001953125 : f32
    %73 = vector.broadcast %cst_37 : f32 to vector<8x1xf32>
    %74 = arith.mulf %72, %73 : vector<8x1xf32>
    %cst_38 = arith.constant 9.99999974E-6 : f32
    %75 = vector.broadcast %cst_38 : f32 to vector<8x1xf32>
    %76 = arith.addf %74, %75 : vector<8x1xf32>
    %77 = math.rsqrt %76 : vector<8x1xf32>
    %78 = arith.mulf %62, %77 : vector<8x1xf32>
    %79 = vector.broadcast %78 : vector<8x1xf32> to vector<8x512xf32>
    %80 = arith.mulf %69, %79 : vector<8x512xf32>
    %81 = vector.broadcast %63 : vector<8x1xf32> to vector<8x512xf32>
    %82 = arith.addf %80, %81 : vector<8x512xf32>
    %cst_39 = arith.constant 0.000000e+00 : f32
    %83 = vector.broadcast %cst_39 : f32 to vector<8x512xf32>
    %84 = arith.maximumf %82, %83 : vector<8x512xf32>
    %c17_i32_40 = arith.constant 17 : i32
    %85 = tpu.dynamic_rotate %84 by %c17_i32_40 dim 1 : vector<8x512xf32>, i32 -> vector<8x512xf32>
    %86 = vector.extract_strided_slice %12 {offsets = [0, 0], sizes = [1, 512], strides = [1, 1]} : vector<9x512xf32> to vector<1x512xf32>
    %87 = vector.broadcast %86 : vector<1x512xf32> to vector<8x512xf32>
    %88 = arith.mulf %85, %87 : vector<8x512xf32>
    %c0_41 = arith.constant 0 : index
    %c0_42 = arith.constant 0 : index
    %89 = vector.load %arg13[%c0_41, %c0_42] : memref<72x512xf32, #tpu.memory_space<vmem>>, vector<8x512xf32>
    tpu.vector_store %arg13[%c0_41, %c0_42], %88 {strides = array<i32>} : memref<72x512xf32, #tpu.memory_space<vmem>>, vector<8x512xf32>,
    %c16_i32_43 = arith.constant 16 : i32
    %90 = tpu.dynamic_rotate %84 by %c16_i32_43 dim 1 : vector<8x512xf32>, i32 -> vector<8x512xf32>
    %91 = vector.extract_strided_slice %12 {offsets = [1, 0], sizes = [1, 512], strides = [1, 1]} : vector<9x512xf32> to vector<1x512xf32>
    %92 = vector.broadcast %91 : vector<1x512xf32> to vector<8x512xf32>
    %93 = arith.mulf %90, %92 : vector<8x512xf32>
    %c8_44 = arith.constant 8 : index
    %c0_45 = arith.constant 0 : index
    %94 = vector.load %arg13[%c8_44, %c0_45] : memref<72x512xf32, #tpu.memory_space<vmem>>, vector<8x512xf32>
    tpu.vector_store %arg13[%c8_44, %c0_45], %93 {strides = array<i32>} : memref<72x512xf32, #tpu.memory_space<vmem>>, vector<8x512xf32>,
    %c15_i32_46 = arith.constant 15 : i32
    %95 = tpu.dynamic_rotate %84 by %c15_i32_46 dim 1 : vector<8x512xf32>, i32 -> vector<8x512xf32>
    %96 = vector.extract_strided_slice %12 {offsets = [2, 0], sizes = [1, 512], strides = [1, 1]} : vector<9x512xf32> to vector<1x512xf32>
    %97 = vector.broadcast %96 : vector<1x512xf32> to vector<8x512xf32>
    %98 = arith.mulf %95, %97 : vector<8x512xf32>
    %c16_47 = arith.constant 16 : index
    %c0_48 = arith.constant 0 : index
    %99 = vector.load %arg13[%c16_47, %c0_48] : memref<72x512xf32, #tpu.memory_space<vmem>>, vector<8x512xf32>
    tpu.vector_store %arg13[%c16_47, %c0_48], %98 {strides = array<i32>} : memref<72x512xf32, #tpu.memory_space<vmem>>, vector<8x512xf32>,
    %c1_i32_49 = arith.constant 1 : i32
    %100 = tpu.dynamic_rotate %84 by %c1_i32_49 dim 1 : vector<8x512xf32>, i32 -> vector<8x512xf32>
    %101 = vector.extract_strided_slice %12 {offsets = [3, 0], sizes = [1, 512], strides = [1, 1]} : vector<9x512xf32> to vector<1x512xf32>
    %102 = vector.broadcast %101 : vector<1x512xf32> to vector<8x512xf32>
    %103 = arith.mulf %100, %102 : vector<8x512xf32>
    %c24_50 = arith.constant 24 : index
    %c0_51 = arith.constant 0 : index
    %104 = vector.load %arg13[%c24_50, %c0_51] : memref<72x512xf32, #tpu.memory_space<vmem>>, vector<8x512xf32>
    tpu.vector_store %arg13[%c24_50, %c0_51], %103 {strides = array<i32>} : memref<72x512xf32, #tpu.memory_space<vmem>>, vector<8x512xf32>,
    %105 = vector.extract_strided_slice %12 {offsets = [4, 0], sizes = [1, 512], strides = [1, 1]} : vector<9x512xf32> to vector<1x512xf32>
    %106 = vector.broadcast %105 : vector<1x512xf32> to vector<8x512xf32>
    %107 = arith.mulf %84, %106 : vector<8x512xf32>
    %c32_52 = arith.constant 32 : index
    %c0_53 = arith.constant 0 : index
    %108 = vector.load %arg13[%c32_52, %c0_53] : memref<72x512xf32, #tpu.memory_space<vmem>>, vector<8x512xf32>
    tpu.vector_store %arg13[%c32_52, %c0_53], %107 {strides = array<i32>} : memref<72x512xf32, #tpu.memory_space<vmem>>, vector<8x512xf32>,
    %c511_i32_54 = arith.constant 511 : i32
    %109 = tpu.dynamic_rotate %84 by %c511_i32_54 dim 1 : vector<8x512xf32>, i32 -> vector<8x512xf32>
    %110 = vector.extract_strided_slice %12 {offsets = [5, 0], sizes = [1, 512], strides = [1, 1]} : vector<9x512xf32> to vector<1x512xf32>
    %111 = vector.broadcast %110 : vector<1x512xf32> to vector<8x512xf32>
    %112 = arith.mulf %109, %111 : vector<8x512xf32>
    %c40_55 = arith.constant 40 : index
    %c0_56 = arith.constant 0 : index
    %113 = vector.load %arg13[%c40_55, %c0_56] : memref<72x512xf32, #tpu.memory_space<vmem>>, vector<8x512xf32>
    tpu.vector_store %arg13[%c40_55, %c0_56], %112 {strides = array<i32>} : memref<72x512xf32, #tpu.memory_space<vmem>>, vector<8x512xf32>,
    %c497_i32_57 = arith.constant 497 : i32
    %114 = tpu.dynamic_rotate %84 by %c497_i32_57 dim 1 : vector<8x512xf32>, i32 -> vector<8x512xf32>
    %115 = vector.extract_strided_slice %12 {offsets = [6, 0], sizes = [1, 512], strides = [1, 1]} : vector<9x512xf32> to vector<1x512xf32>
    %116 = vector.broadcast %115 : vector<1x512xf32> to vector<8x512xf32>
    %117 = arith.mulf %114, %116 : vector<8x512xf32>
    %c48_58 = arith.constant 48 : index
    %c0_59 = arith.constant 0 : index
    %118 = vector.load %arg13[%c48_58, %c0_59] : memref<72x512xf32, #tpu.memory_space<vmem>>, vector<8x512xf32>
    tpu.vector_store %arg13[%c48_58, %c0_59], %117 {strides = array<i32>} : memref<72x512xf32, #tpu.memory_space<vmem>>, vector<8x512xf32>,
    %c496_i32_60 = arith.constant 496 : i32
    %119 = tpu.dynamic_rotate %84 by %c496_i32_60 dim 1 : vector<8x512xf32>, i32 -> vector<8x512xf32>
    %120 = vector.extract_strided_slice %12 {offsets = [7, 0], sizes = [1, 512], strides = [1, 1]} : vector<9x512xf32> to vector<1x512xf32>
    %121 = vector.broadcast %120 : vector<1x512xf32> to vector<8x512xf32>
    %122 = arith.mulf %119, %121 : vector<8x512xf32>
    %c56_61 = arith.constant 56 : index
    %c0_62 = arith.constant 0 : index
    %123 = vector.load %arg13[%c56_61, %c0_62] : memref<72x512xf32, #tpu.memory_space<vmem>>, vector<8x512xf32>
    tpu.vector_store %arg13[%c56_61, %c0_62], %122 {strides = array<i32>} : memref<72x512xf32, #tpu.memory_space<vmem>>, vector<8x512xf32>,
    %c495_i32_63 = arith.constant 495 : i32
    %124 = tpu.dynamic_rotate %84 by %c495_i32_63 dim 1 : vector<8x512xf32>, i32 -> vector<8x512xf32>
    %125 = vector.extract_strided_slice %12 {offsets = [8, 0], sizes = [1, 512], strides = [1, 1]} : vector<9x512xf32> to vector<1x512xf32>
    %126 = vector.broadcast %125 : vector<1x512xf32> to vector<8x512xf32>
    %127 = arith.mulf %124, %126 : vector<8x512xf32>
    %c64_64 = arith.constant 64 : index
    %c0_65 = arith.constant 0 : index
    %128 = vector.load %arg13[%c64_64, %c0_65] : memref<72x512xf32, #tpu.memory_space<vmem>>, vector<8x512xf32>
    tpu.vector_store %arg13[%c64_64, %c0_65], %127 {strides = array<i32>} : memref<72x512xf32, #tpu.memory_space<vmem>>, vector<8x512xf32>,
    %c0_66 = arith.constant 0 : index
    %c0_67 = arith.constant 0 : index
    %129 = vector.load %arg7[%c0_66, %c0_67] : memref<8x72xbf16, #tpu.memory_space<vmem>>, vector<8x72xbf16>
    %c0_68 = arith.constant 0 : index
    %c0_69 = arith.constant 0 : index
    %130 = vector.load %arg13[%c0_68, %c0_69] : memref<72x512xf32, #tpu.memory_space<vmem>>, vector<72x512xf32>
    %131 = arith.truncf %130 : vector<72x512xf32> to vector<72x512xbf16>
    %cst_70 = arith.constant dense<0.000000e+00> : vector<8x512xf32>
    %132 = tpu.matmul %129, %131, %cst_70 {dimension_numbers = #tpu.dot_dimension_numbers<[1], [0], [0], [1], [0, 0, 1, 1], [], []>} : vector<8x72xbf16>, vector<72x512xbf16>, vector<8x512xf32> -> vector<8x512xf32>
    %c0_71 = arith.constant 0 : index
    %c0_72 = arith.constant 0 : index
    %133 = vector.load %arg8[%c0_71, %c0_72] : memref<8x1xf32, #tpu.memory_space<vmem>>, vector<8x1xf32>
    %c0_73 = arith.constant 0 : index
    %c0_74 = arith.constant 0 : index
    %134 = vector.load %arg9[%c0_73, %c0_74] : memref<8x1xf32, #tpu.memory_space<vmem>>, vector<8x1xf32>
    %cst_75 = arith.constant dense<0.000000e+00> : vector<8xf32>
    %135 = vector.multi_reduction <add>, %132, %cst_75 [1] : vector<8x512xf32> to vector<8xf32>
    %136 = vector.shape_cast %135 : vector<8xf32> to vector<8x1xf32>
    %cst_76 = arith.constant 0.001953125 : f32
    %137 = vector.broadcast %cst_76 : f32 to vector<8x1xf32>
    %138 = arith.mulf %136, %137 : vector<8x1xf32>
    %139 = vector.broadcast %138 : vector<8x1xf32> to vector<8x512xf32>
    %140 = arith.subf %132, %139 : vector<8x512xf32>
    %141 = arith.mulf %140, %140 : vector<8x512xf32>
    %cst_77 = arith.constant dense<0.000000e+00> : vector<8xf32>
    %142 = vector.multi_reduction <add>, %141, %cst_77 [1] : vector<8x512xf32> to vector<8xf32>
    %143 = vector.shape_cast %142 : vector<8xf32> to vector<8x1xf32>
    %cst_78 = arith.constant 0.001953125 : f32
    %144 = vector.broadcast %cst_78 : f32 to vector<8x1xf32>
    %145 = arith.mulf %143, %144 : vector<8x1xf32>
    %cst_79 = arith.constant 9.99999974E-6 : f32
    %146 = vector.broadcast %cst_79 : f32 to vector<8x1xf32>
    %147 = arith.addf %145, %146 : vector<8x1xf32>
    %148 = math.rsqrt %147 : vector<8x1xf32>
    %149 = arith.mulf %133, %148 : vector<8x1xf32>
    %150 = vector.broadcast %149 : vector<8x1xf32> to vector<8x512xf32>
    %151 = arith.mulf %140, %150 : vector<8x512xf32>
    %152 = vector.broadcast %134 : vector<8x1xf32> to vector<8x512xf32>
    %153 = arith.addf %151, %152 : vector<8x512xf32>
    %cst_80 = arith.constant 0.000000e+00 : f32
    %154 = vector.broadcast %cst_80 : f32 to vector<8x512xf32>
    %155 = arith.maximumf %153, %154 : vector<8x512xf32>
    %156 = vector.extract_strided_slice %155 {offsets = [0, 0], sizes = [8, 256], strides = [1, 1]} : vector<8x512xf32> to vector<8x256xf32>
    %c0_81 = arith.constant 0 : index
    %c0_82 = arith.constant 0 : index
    %157 = vector.load %arg10[%c0_81, %c0_82] : memref<16x256xf32, #tpu.memory_space<vmem>>, vector<8x256xf32>
    tpu.vector_store %arg10[%c0_81, %c0_82], %156 {strides = array<i32>} : memref<16x256xf32, #tpu.memory_space<vmem>>, vector<8x256xf32>,
    %158 = vector.extract_strided_slice %155 {offsets = [0, 256], sizes = [8, 256], strides = [1, 1]} : vector<8x512xf32> to vector<8x256xf32>
    %c8_83 = arith.constant 8 : index
    %c0_84 = arith.constant 0 : index
    %159 = vector.load %arg10[%c8_83, %c0_84] : memref<16x256xf32, #tpu.memory_space<vmem>>, vector<8x256xf32>
    tpu.vector_store %arg10[%c8_83, %c0_84], %158 {strides = array<i32>} : memref<16x256xf32, #tpu.memory_space<vmem>>, vector<8x256xf32>,
    return
  }
}

</mosaic_0001>

<bundles_post_ra>
// kernel: up_forward.1
= control target key start
LH: loop header
LB: loop body
LE: loop exit
PB: predicated region body
PF: predicated region fallthrough
CT: control target
= control target key end

     0   :  { %v1109_v3 = vmov 0.0   ;;  %vm53_vm0 = vcmask 523264   ;;  %s1113_s11 = smov 15   ;;  %s1114_s12 = smov 127   ;;  %v1118_v38 = vmov 0   ;;  %v170_v44 = vlaneseq  ;;  %s1859_s2 = inlined_call_operand.vmem [shape: f32[64,256], index: 2, kind: input, shape index: {}]   ;;  %s1860_s1 = inlined_call_operand.vmem [shape: f32[8,64], index: 1, kind: input, shape index: {}]   ;;  %s1861_s0 = inlined_call_operand.vmem [shape: f32[8,256], index: 0, kind: input, shape index: {}]   ;;  %s1862_s3 = inlined_call_operand.vmem [shape: f32[9,512], index: 3, kind: input, shape index: {}]   ;;  %s1863_s4 = inlined_call_operand.vmem [shape: bf16[8,72], index: 4, kind: input, shape index: {}]   ;;  %s1864_s6 = inlined_call_operand.vmem [shape: f32[8,1], index: 6, kind: input, shape index: {}]   ;;  %s1865_s5 = inlined_call_operand.vmem [shape: f32[8,1], index: 5, kind: input, shape index: {}]   ;;  %s1866_s7 = inlined_call_operand.vmem [shape: bf16[8,72], index: 7, kind: input, shape index: {}]   ;;  %s1867_s9 = inlined_call_operand.vmem [shape: f32[8,1], index: 9, kind: input, shape index: {}]   ;;  %s1868_s8 = inlined_call_operand.vmem [shape: f32[8,1], index: 8, kind: input, shape index: {}]   ;;  %s1869_s10 = inlined_call_operand.vmem [shape: f32[16,256], index: 10, kind: output, shape index: {}]  }
   0x1   :  { %v38_v0 = vld [vmem:[%s1859_s2 + $0x8] sm:$0xff]  ;;  %v40_v1 = vld [vmem:[%s1859_s2 + $0x18] sm:$0xff]  ;;  %v37_v2 = vld [vmem:[%s1859_s2] sm:$0xff]  ;;  %121 = vmatprep.mubr.f32.mxu0 %v1109_v3  ;;  %s1115_s13 = smov 113   ;;  %s1116_s14 = smov 112   ;;  %590 = vmatprep.mubr.bf16.mxu1 %v1118_v38  ;;  %vm545_vm9 = vcmask 1043456  }
   0x2   :  { %v1077_v4 = vpack.c.bf16 %v40_v1, %v38_v0  ;;  %v39_v5 = vld [vmem:[%s1859_s2 + $0x10] sm:$0xff]  ;;  %v42_v6 = vld [vmem:[%s1859_s2 + $0x28] sm:$0xff]  ;;  %v44_v7 = vld [vmem:[%s1859_s2 + $0x38] sm:$0xff]  ;;  %s1117_s15 = smov 111   ;;  %1103 = vset.pattern.permute.xlu0 %v1118_v38  ;;  %1104 = vset.pattern.permute.xlu1 %v1118_v38  ;;  %v1317_v46 = vand.u32 127, %v170_v44  ;;  %v1319_v47 = vshrl.u32 %v170_v44, 7 }
   0x3   :  { %v1079_v8 = vpack.c.bf16 %v39_v5, %v37_v2  ;;  %v1081_v9 = vpack.c.bf16 %v44_v7, %v42_v6  ;;  %v41_v10 = vld [vmem:[%s1859_s2 + $0x20] sm:$0xff]  ;;  %v43_v11 = vld [vmem:[%s1859_s2 + $0x30] sm:$0xff]  ;;  %v46_v12 = vld [vmem:[%s1859_s2 + $0x48] sm:$0xff]  ;;  %vm541_vm10 = vcmask 588800  }
   0x4   :  { %1078 = vmatprep.subr.bf16.mxu0 %v1077_v4  ;;  %v48_v13 = vld [vmem:[%s1859_s2 + $0x58] sm:$0xff]  ;;  %v1083_v14 = vpack.c.bf16 %v43_v11, %v41_v10  ;;  %v45_v16 = vld [vmem:[%s1859_s2 + $0x40] sm:$0xff]  ;;  %v47_v17 = vld [vmem:[%s1859_s2 + $0x50] sm:$0xff]  ;;  %v179_v50 = vsub.s32 0, %v1319_v47  ;;  %v216_v51 = vsub.s32 1, %v1319_v47  ;;  %vm172_vm1 = vcmp.lt.s32.totalorder %v1317_v46, 17 }
   0x5   :  { %1080 = vmatpush1.bf16.msra.mxu0 %v1079_v8  ;;  %v1085_v15 = vpack.c.bf16 %v48_v13, %v46_v12  ;;  %v50_v18 = vld [vmem:[%s1859_s2 + $0x68] sm:$0xff]  ;;  %v52_v19 = vld [vmem:[%s1859_s2 + $0x78] sm:$0xff]  ;;  %v1087_v20 = vpack.c.bf16 %v47_v17, %v45_v16  ;;  %v49_v22 = vld [vmem:[%s1859_s2 + $0x60] sm:$0xff]  ;;  %vm209_vm2 = vcmp.lt.s32.totalorder %v1317_v46, 16  ;;  %v314_v2 = vsub.s32 4, %v1319_v47 }
   0x6   :  { %1082 = vmatprep.subr.bf16.mxu0 %v1081_v9  ;;  %v1089_v21 = vpack.c.bf16 %v52_v19, %v50_v18  ;;  %v51_v23 = vld [vmem:[%s1859_s2 + $0x70] sm:$0xff]  ;;  %v36_v25 = vld [vmem:[%s1860_s1] sm:$0xff]  ;;  %v129_v28 = vld [vmem:[%s1861_s0 + $0x8] sm:$0xff]  ;;  %s1110_s1 = smov 16   ;;  %s1111_s2 = smov 17   ;;  %v253_v5 = vsub.s32 2, %v1319_v47 }
   0x7   :  { %v1091_v24 = vpack.c.bf16 %v51_v23, %v49_v22  ;;  %v128_v26 = vld [vmem:[%s1861_s0] sm:$0xff]  ;;  %v143_v29 = vrot.slane %v129_v28, 4  ;;  %131 = vst [vmem:[#allocation2 + $0x8] sm:$0xf] %v129_v28  ;;  %s1112_s0 = smov 1   ;;  %v1333_v54 = vld [vmem:[%s1862_s3 + $0x18] sm:$0xff] }
   0x8   :  { %v142_v27 = vrot.slane %v128_v26, 4  ;;  %130 = vst [vmem:[#allocation2] sm:$0xf] %v128_v26  ;;  %v1336_v55 = vrot.slane %v1333_v54, %v179_v50  ;;  %v1340_v56 = vrot.slane %v1333_v54, %v216_v51  ;;  %v1360_v3 = vld [vmem:[%s1862_s3 + $0x10] sm:$0xff]  ;;  %v1365_v4 = vld [vmem:[%s1862_s3] sm:$0xff]  ;;  %v290_v6 = vsub.s32 3, %v1319_v47 }
   0x9   :  { %1084 = vmatpush1.bf16.msra.mxu0 %v1083_v14  ;;  %147 = vst [vmem:[#allocation2 + $0x18] sm:$0xf] %v143_v29  ;;  %v1370_v7 = vrot.slane %v1360_v3, %v314_v2  ;;  %v1379_v10 = vld [vmem:[%s1862_s3 + $0x8] sm:$0xff]  ;;  %v1382_v11 = vrot.slane %v1333_v54, %v314_v2  ;;  %v1385_v12 = vrot.slane %v1365_v4, %v314_v2  ;;  %vm283_vm3 = vcmp.lt.s32.totalorder %v1317_v46, 1 }
   0xa   :  { %1086 = vmatprep.subr.bf16.mxu0 %v1085_v15  ;;  %146 = vst [vmem:[#allocation2 + $0x10] sm:$0xf] %v142_v27  ;;  %vm246_vm4 = vcmp.lt.s32.totalorder %v1317_v46, 15  ;;  %v1390_v13 = vrot.slane %v1333_v54, %v253_v5  ;;  %v1393_v14 = vrot.slane %v1379_v10, %v314_v2  ;;  %v1396_v15 = vrot.slane %v1333_v54, %v290_v6 }
   0xb   :  { %v1403_v17 = vrot.slane %v1365_v4, %v216_v51  ;;  %v1428_v26 = vrot.slane %v1360_v3, %v179_v50  ;;  %v1431_v27 = vrot.slane %v1379_v10, %v179_v50  ;;  %v1434_v28 = vrot.slane %v1379_v10, %v216_v51 }
   0xc   :  { %v1437_v29 = vrot.slane %v1365_v4, %v253_v5  ;;  %vm344_vm5 = vcmp.lt.s32.totalorder %v1317_v46, 127  ;;  %vm381_vm6 = vcmp.lt.s32.totalorder %v1317_v46, 113  ;;  %vm418_vm7 = vcmp.lt.s32.totalorder %v1317_v46, 112 }
   0xd   :  { %1088 = vmatpush1.bf16.msra.mxu0 %v1087_v20  ;;  %vm455_vm8 = vcmp.lt.s32.totalorder %v1317_v46, 111 }
   0xe   :  { %1090 = vmatprep.subr.bf16.mxu0 %v1089_v21  ;;  %v1412_v21 = vrot.slane %v1365_v4, %v179_v50 }
  0x11   :  { %1092 = vmatpush1.bf16.msra.mxu0 %v1091_v24 }
  0x14   :  { %1064 = vmatmul.mubr.msk.f32.vlgmr.msra.gmra.mrb[0].mxu0 %vm53_vm0, %v36_v25  ;;  %v1425_v25 = vrot.slane %v1360_v3, %v216_v51 }
  0x15   :  { %631 = vmatprep.mubr.bf16.mxu0 %v1118_v38 }
  0xe7   :  { %v123_v30 = vpop.f32.mrb[0].mxu0 }
  0xe8   :  { %v134_v31 = vrot.slane %v123_v30, 4  ;;  %148 = vst [vmem:[#allocation2 + $0x10] sm:$0xf0] %v123_v30  ;;  %v125_v32 = vpop.f32.mrb[1].mxu0  ;;  %v1440_v30 = vrot.slane %v1365_v4, %v290_v6 }
  0xe9   :  { %v135_v33 = vrot.slane %v125_v32, 4  ;;  %149 = vst [vmem:[#allocation2 + $0x18] sm:$0xf0] %v125_v32 }
  0xea   :  { %138 = vst [vmem:[#allocation2] sm:$0xf0] %v134_v31  ;;  %v351_v31 = vsub.s32 5, %v1319_v47 }
  0xeb   :  { %139 = vst [vmem:[#allocation2 + $0x8] sm:$0xf0] %v135_v33 }
  0xef   :  { %v1231_v34 = vld [vmem:[#allocation2 + $0x10] sm:$0xff] }
  0xf0   :  { %205 = vrot.lane.b32.xlu1 %v1231_v34, %s1110_s1  ;;  %166 = vrot.lane.b32.xlu0 %v1231_v34, %s1111_s2  ;;  %v1241_v35 = vld [vmem:[#allocation2 + $0x18] sm:$0xff]  ;;  %v1400_v16 = vmul.f32 %v1370_v7, %v1231_v34 }
  0xf1   :  { %v1251_v36 = vld [vmem:[#allocation2] sm:$0xff]  ;;  %v1409_v20 = vmul.f32 %v1382_v11, %v1241_v35 }
  0xf2   :  { %v1273_v37 = vld [vmem:[#allocation2 + $0x8] sm:$0xff]  ;;  %v1422_v24 = vmul.f32 %v1385_v12, %v1251_v36 }
  0xf3   :  { %v1445_v32 = vmul.f32 %v1393_v14, %v1273_v37 }
  0xf4   :  { %279 = vrot.lane.b32.xlu1 %v1231_v34, %s1112_s0  ;;  %242 = vrot.lane.b32.xlu0 %v1231_v34, %s1113_s11 }
  0xf8   :  { %340 = vrot.lane.b32.xlu1 %v1231_v34, %s1114_s12  ;;  %168 = vrot.lane.b32.xlu0 %v1241_v35, %s1111_s2 }
  0xfc   :  { %377 = vrot.lane.b32.xlu1 %v1231_v34, %s1115_s13  ;;  %244 = vrot.lane.b32.xlu0 %v1241_v35, %s1113_s11 }
 0x100   :  { %414 = vrot.lane.b32.xlu1 %v1231_v34, %s1116_s14  ;;  %162 = vrot.lane.b32.xlu0 %v1251_v36, %s1111_s2 }
 0x104   :  { %207 = vrot.lane.b32.xlu1 %v1241_v35, %s1110_s1  ;;  %238 = vrot.lane.b32.xlu0 %v1251_v36, %s1113_s11 }
 0x108   :  { %281 = vrot.lane.b32.xlu1 %v1241_v35, %s1112_s0  ;;  %275 = vrot.lane.b32.xlu0 %v1251_v36, %s1112_s0 }
 0x10c   :  { %342 = vrot.lane.b32.xlu1 %v1241_v35, %s1114_s12  ;;  %336 = vrot.lane.b32.xlu0 %v1251_v36, %s1114_s12 }
 0x110   :  { %201 = vrot.lane.b32.xlu1 %v1251_v36, %s1110_s1  ;;  %373 = vrot.lane.b32.xlu0 %v1251_v36, %s1115_s13 }
 0x114   :  { %203 = vrot.lane.b32.xlu1 %v1273_v37, %s1110_s1  ;;  %164 = vrot.lane.b32.xlu0 %v1273_v37, %s1111_s2 }
 0x118   :  { %240 = vrot.lane.b32.xlu1 %v1273_v37, %s1113_s11  ;;  %379 = vrot.lane.b32.xlu0 %v1241_v35, %s1115_s13 }
 0x11c   :  { %277 = vrot.lane.b32.xlu1 %v1273_v37, %s1112_s0  ;;  %447 = vrot.lane.b32.xlu0 %v1251_v36, %s1117_s15 }
 0x120   :  { %410 = vrot.lane.b32.xlu1 %v1251_v36, %s1116_s14  ;;  %338 = vrot.lane.b32.xlu0 %v1273_v37, %s1114_s12 }
 0x124   :  { %416 = vrot.lane.b32.xlu1 %v1241_v35, %s1116_s14  ;;  %375 = vrot.lane.b32.xlu0 %v1273_v37, %s1115_s13 }
 0x128   :  { %449 = vrot.lane.b32.xlu1 %v1273_v37, %s1117_s15  ;;  %412 = vrot.lane.b32.xlu0 %v1273_v37, %s1116_s14 }
 0x12c   :  { %453 = vrot.lane.b32.xlu1 %v1241_v35, %s1117_s15  ;;  %451 = vrot.lane.b32.xlu0 %v1231_v34, %s1117_s15 }
 0x162   :  { %v1307_v39 = vpop.permute.xlu1 %205  ;;  %v1309_v40 = vpop.permute.xlu0 %166 }
 0x166   :  { %v1311_v41 = vpop.permute.xlu1 %279  ;;  %v1313_v42 = vpop.permute.xlu0 %242 }
 0x16a   :  { %v1315_v43 = vpop.permute.xlu1 %340  ;;  %v169_v45 = vpop.permute.xlu0 %168 }
 0x16b   :  { %v173_v57 = vsel %vm172_vm1, %v1309_v40, %v169_v45 }
 0x16c   :  { %v196_v61 = vmul.f32 %v1336_v55, %v173_v57 }
 0x16e   :  { %v1321_v48 = vpop.permute.xlu1 %377  ;;  %v1323_v49 = vpop.permute.xlu0 %244 }
 0x16f   :  { %v247_v33 = vsel %vm246_vm4, %v1313_v42, %v1323_v49 }
 0x172   :  { %v1328_v52 = vpop.permute.xlu1 %414  ;;  %v163_v53 = vpop.permute.xlu0 %162 }
 0x173   :  { %v176_v34 = vsel %vm172_vm1, %v169_v45, %v163_v53 }
 0x176   :  { %v208_v58 = vpop.permute.xlu1 %207  ;;  %v1345_v59 = vpop.permute.xlu0 %238 }
 0x177   :  { %v210_v60 = vsel %vm209_vm2, %v1307_v39, %v208_v58 }
 0x178   :  { %v233_v62 = vmul.f32 %v1340_v56, %v210_v60 }
 0x17a   :  { %v1352_v63 = vpop.permute.xlu1 %281  ;;  %v1354_v0 = vpop.permute.xlu0 %275  ;;  %v524_v1 = vpack.c.bf16 %v233_v62, %v196_v61 }
 0x17b   :  { %v284_v22 = vsel %vm283_vm3, %v1311_v41, %v1352_v63 }
 0x17c   :  { %599 = vmatprep.subr.bf16.mxu0 %v524_v1  ;;  %v307_v35 = vmul.f32 %v1396_v15, %v284_v22  ;;  %v1472_v1 = vrot.slane %v1360_v3, %v351_v31 }
 0x17e   :  { %v1372_v8 = vpop.permute.xlu1 %342  ;;  %v1374_v9 = vpop.permute.xlu0 %336 }
 0x182   :  { %v202_v18 = vpop.permute.xlu1 %201  ;;  %v1405_v19 = vpop.permute.xlu0 %373 }
 0x183   :  { %v213_v23 = vsel %vm209_vm2, %v208_v58, %v202_v18 }
 0x184   :  { %v230_v36 = vmul.f32 %v1403_v17, %v213_v23 }
 0x186   :  { %v204_v44 = vpop.permute.xlu1 %203  ;;  %v165_v50 = vpop.permute.xlu0 %164 }
 0x187   :  { %v211_v51 = vsel %vm209_vm2, %v204_v44, %v1307_v39  ;;  %v212_v37 = vsel %vm209_vm2, %v202_v18, %v204_v44  ;;  %v174_v57 = vsel %vm172_vm1, %v165_v50, %v1309_v40  ;;  %v175_v45 = vsel %vm172_vm1, %v163_v53, %v165_v50 }
 0x188   :  { %v232_v58 = vmul.f32 %v1425_v25, %v211_v51  ;;  %v195_v60 = vmul.f32 %v1428_v26, %v174_v57  ;;  %v194_v61 = vmul.f32 %v1431_v27, %v175_v45  ;;  %v231_v62 = vmul.f32 %v1434_v28, %v212_v37 }
 0x189   :  { %v193_v39 = vmul.f32 %v1412_v21, %v176_v34  ;;  %v1475_v40 = vrot.slane %v1333_v54, %v351_v31  ;;  %v270_v53 = vmul.f32 %v1390_v13, %v247_v33  ;;  %v1479_v18 = vrot.slane %v1379_v10, %v253_v5 }
 0x18a   :  { %v523_v2 = vpack.c.bf16 %v232_v58, %v195_v60  ;;  %v241_v22 = vpop.permute.xlu1 %240  ;;  %v380_v23 = vpop.permute.xlu0 %379  ;;  %v522_v44 = vpack.c.bf16 %v231_v62, %v194_v61  ;;  %v250_v34 = vsel %vm246_vm4, %v1323_v49, %v1345_v59  ;;  %v287_v50 = vsel %vm283_vm3, %v1352_v63, %v1354_v0 }
 0x18b   :  { %v1490_v51 = vrot.slane %v1360_v3, %v253_v5  ;;  %v521_v33 = vpack.c.bf16 %v230_v36, %v193_v39  ;;  %v348_v37 = vsel %vm344_vm5, %v1372_v8, %v1374_v9  ;;  %v528_v57 = vpack.c.bf16 %v307_v35, %v270_v53 }
 0x18c   :  { %558 = vmatprep.subr.bf16.mxu1 %v522_v44  ;;  %v1497_v45 = vrot.slane %v1379_v10, %v290_v6  ;;  %v1500_v49 = vrot.slane %v1360_v3, %v290_v6  ;;  %v248_v63 = vsel %vm246_vm4, %v241_v22, %v1313_v42  ;;  %v249_v5 = vsel %vm246_vm4, %v1345_v59, %v241_v22 }
 0x18d   :  { %v388_v36 = vsub.s32 6, %v1319_v47  ;;  %600 = vmatpush1.bf16.msra.mxu0 %v523_v2  ;;  %559 = vmatpush1.bf16.msra.mxu1 %v521_v33  ;;  %v425_v35 = vsub.s32 7, %v1319_v47  ;;  %v267_v58 = vmul.f32 %v1437_v29, %v250_v34  ;;  %v304_v60 = vmul.f32 %v1440_v30, %v287_v50 }
 0x18e   :  { %601 = vmatprep.subr.bf16.mxu0 %v528_v57  ;;  %v278_v6 = vpop.permute.xlu1 %277  ;;  %v1512_v61 = vpop.permute.xlu0 %447  ;;  %v1515_v42 = vrot.slane %v1365_v4, %v351_v31  ;;  %v1518_v62 = vrot.slane %v1379_v10, %v351_v31  ;;  %v345_v59 = vsel %vm344_vm5, %v1315_v43, %v1372_v8  ;;  %v368_v47 = vmul.f32 %v1475_v40, %v348_v37 }
 0x18f   :  { %v285_v39 = vsel %vm283_vm3, %v278_v6, %v1311_v41  ;;  %v286_v53 = vsel %vm283_vm3, %v1354_v0, %v278_v6  ;;  %v268_v2 = vmul.f32 %v1479_v18, %v249_v5  ;;  %v269_v31 = vmul.f32 %v1490_v51, %v248_v63 }
 0x190   :  { %v305_v22 = vmul.f32 %v1497_v45, %v286_v53  ;;  %v306_v44 = vmul.f32 %v1500_v49, %v285_v39  ;;  %v1537_v8 = vrot.slane %v1360_v3, %v388_v36  ;;  %v1540_v34 = vrot.slane %v1333_v54, %v388_v36 }
 0x191   :  { %v1543_v41 = vrot.slane %v1360_v3, %v425_v35  ;;  %v525_v57 = vpack.c.bf16 %v304_v60, %v267_v58  ;;  %v1546_v63 = vrot.slane %v1333_v54, %v425_v35  ;;  %v367_v5 = vmul.f32 %v1472_v1, %v345_v59 }
 0x192   :  { %v527_v0 = vpack.c.bf16 %v306_v44, %v269_v31  ;;  %v411_v50 = vpop.permute.xlu1 %410  ;;  %v339_v33 = vpop.permute.xlu0 %338  ;;  %v526_v37 = vpack.c.bf16 %v305_v22, %v268_v2  ;;  %v532_v3 = vpack.c.bf16 %v368_v47, %v1409_v20  ;;  %v382_v53 = vsel %vm381_vm6, %v1321_v48, %v380_v23 }
 0x193   :  { %v346_v6 = vsel %vm344_vm5, %v339_v33, %v1315_v43  ;;  %v347_v39 = vsel %vm344_vm5, %v1374_v9, %v339_v33  ;;  %v385_v43 = vsel %vm381_vm6, %v380_v23, %v1405_v19  ;;  %v1566_v9 = vrot.slane %v1365_v4, %v388_v36 }
 0x194   :  { %v365_v58 = vmul.f32 %v1515_v42, %v347_v39  ;;  %v366_v54 = vmul.f32 %v1518_v62, %v346_v6  ;;  %560 = vmatprep.subr.bf16.mxu1 %v526_v37  ;;  %602 = vmatpush1.bf16.msra.mxu0 %v527_v0  ;;  %v1569_v20 = vrot.slane %v1379_v10, %v388_v36 }
 0x195   :  { %561 = vmatpush1.bf16.msra.mxu1 %v525_v57  ;;  %603 = vmatprep.subr.bf16.mxu0 %v532_v3  ;;  %v1575_v31 = vrot.slane %v1365_v4, %v425_v35  ;;  %v1578_v23 = vrot.slane %v1379_v10, %v425_v35  ;;  %v531_v22 = vpack.c.bf16 %v367_v5, %v1400_v16  ;;  %v1599_v35 = vld [vmem:[%s1862_s3 + $0x20] ss:$0 sm:$0xff] }
 0x196   :  { %v417_v60 = vpop.permute.xlu1 %416  ;;  %v376_v59 = vpop.permute.xlu0 %375  ;;  %v530_v47 = vpack.c.bf16 %v366_v54, %v1445_v32  ;;  %v529_v2 = vpack.c.bf16 %v365_v58, %v1422_v24  ;;  %v404_v44 = vmul.f32 %v1537_v8, %v382_v53  ;;  %v405_v32 = vmul.f32 %v1540_v34, %v385_v43  ;;  %v1617_v43 = vld [vmem:[%s1862_s3 + $0x38] ss:$0 sm:$0xff] }
 0x197   :  { %v419_v36 = vsel %vm418_vm7, %v1328_v52, %v417_v60  ;;  %v422_v0 = vsel %vm418_vm7, %v417_v60, %v411_v50  ;;  %v384_v10 = vsel %vm381_vm6, %v1405_v19, %v376_v59  ;;  %v383_v16 = vsel %vm381_vm6, %v376_v59, %v1321_v48 }
 0x198   :  { %v441_v24 = vmul.f32 %v1543_v41, %v419_v36  ;;  %v442_v4 = vmul.f32 %v1546_v63, %v422_v0  ;;  %562 = vmatprep.subr.bf16.mxu1 %v530_v47  ;;  %604 = vmatpush1.bf16.msra.mxu0 %v531_v22  ;;  %v402_v6 = vmul.f32 %v1566_v9, %v384_v10 }
 0x199   :  { %563 = vmatpush1.bf16.msra.mxu1 %v529_v2  ;;  %v403_v3 = vmul.f32 %v1569_v20, %v383_v16 }
 0x19a   :  { %v535_v33 = vpack.c.bf16 %v441_v24, %v404_v44  ;;  %v450_v37 = vpop.permute.xlu1 %449  ;;  %v413_v57 = vpop.permute.xlu0 %412  ;;  %v536_v5 = vpack.c.bf16 %v442_v4, %v405_v32 }
 0x19b   :  { %v458_v19 = vsel %vm455_vm8, %v1512_v61, %v450_v37  ;;  %v420_v48 = vsel %vm418_vm7, %v413_v57, %v1328_v52  ;;  %v421_v39 = vsel %vm418_vm7, %v411_v50, %v413_v57  ;;  %v1622_v52 = vld [vmem:[%s1862_s3 + $0x28] ss:$0 sm:$0xff]  ;;  %v1627_v50 = vld [vmem:[%s1862_s3 + $0x30] ss:$0 sm:$0xff]  ;;  %v484_v57 = vld [vmem:[%s1863_s4] sm:$0xf] }
 0x19c   :  { %v476_v53 = vmul.f32 %v1599_v35, %v458_v19  ;;  %v439_v58 = vmul.f32 %v1575_v31, %v421_v39  ;;  %v440_v54 = vmul.f32 %v1578_v23, %v420_v48  ;;  %605 = vmatprep.subr.bf16.mxu0 %v536_v5 }
 0x19d   :  { %606 = vmatpush1.bf16.msra.mxu0 %v535_v33 }
 0x19e   :  { %v454_v60 = vpop.permute.xlu1 %453  ;;  %v452_v59 = vpop.permute.xlu0 %451  ;;  %v534_v47 = vpack.c.bf16 %v440_v54, %v403_v3  ;;  %v533_v2 = vpack.c.bf16 %v439_v58, %v402_v6  ;;  %v537_v0 = vpack.c.bf16 %v476_v53, %v476_v53 }
 0x19f   :  { %v459_v22 = vsel %vm455_vm8, %v454_v60, %v1512_v61  ;;  %v456_v44 = vsel %vm455_vm8, %v452_v59, %v454_v60  ;;  %v457_v36 = vsel %vm455_vm8, %v450_v37, %v452_v59 }
 0x1a0   :  { %v479_v32 = vmul.f32 %v1617_v43, %v459_v22  ;;  %v477_v24 = vmul.f32 %v1622_v52, %v457_v36  ;;  %v478_v4 = vmul.f32 %v1627_v50, %v456_v44  ;;  %564 = vmatprep.subr.bf16.mxu1 %v534_v47  ;;  %v547_v61 = vsel %vm545_vm9, %v537_v0, 0 }
 0x1a1   :  { %565 = vmatpush1.bf16.msra.mxu1 %v533_v2 }
 0x1a2   :  { %v540_v10 = vpack.c.bf16 %v479_v32, %v479_v32  ;;  %v538_v16 = vpack.c.bf16 %v477_v24, %v477_v24  ;;  %v539_v33 = vpack.c.bf16 %v478_v4, %v478_v4 }
 0x1a4   :  { %1069 = vmatprep.subr.msk.bf16.mxu1 %vm545_vm9, %v538_v16  ;;  %1071 = vmatprep.subr.msk.bf16.mxu0 %vm545_vm9, %v540_v10  ;;  %v553_v37 = vsel %vm545_vm9, %v539_v33, 0 }
 0x1a5   :  { %567 = vmatpush1.bf16.msra.mxu1 %v547_v61  ;;  %608 = vmatpush1.bf16.msra.mxu0 %v553_v37  ;;  %v641_v61 = vld [vmem:[%s1864_s6] sm:$0xff] }
 0x1a8   :  { %1070 = vmatmul.mubr.msk.bf16.vlgmr.msra.gmra.mrb[0].mxu1 %vm541_vm10, %v484_v57  ;;  %1072 = vmatmul.mubr.msk.bf16.vlgmr.msra.gmra.mrb[4].mxu0 %vm541_vm10, %v484_v57 }
 0x1a9   :  { %959 = vmatprep.mubr.bf16.mxu1 %v1118_v38  ;;  %1000 = vmatprep.mubr.bf16.mxu0 %v1118_v38 }
 0x27b   :  { %v592_v5 = vpop.f32.mrb[0].mxu1  ;;  %v633_v6 = vpop.f32.mrb[4].mxu0 }
 0x27c   :  { %v594_v19 = vpop.f32.mrb[1].mxu1  ;;  %v635_v48 = vpop.f32.mrb[5].mxu0 }
 0x27d   :  { %v642_v39 = vadd.f32 %v594_v19, %v592_v5  ;;  %v596_v3 = vpop.f32.mrb[2].mxu1  ;;  %v637_v53 = vpop.f32.mrb[6].mxu0 }
 0x27e   :  { %v597_v58 = vpop.f32.mrb[3].mxu1  ;;  %v638_v54 = vpop.f32.mrb[7].mxu0 }
 0x27f   :  { %v643_v60 = vadd.f32 %v642_v39, %v633_v6 }
 0x281   :  { %v644_v59 = vadd.f32 %v643_v60, %v635_v48 }
 0x283   :  { %645 = vadd.xlane.f32.xlu0 %v644_v59 }
 0x310   :  { %v646_v47 = vpop.xlane.xlu0 %645 }
 0x311   :  { %v647_v2 = vmul.f32 0.001953125, %v646_v47 }
 0x313   :  { %v648_v22 = vsub.f32 %v592_v5, %v647_v2  ;;  %v649_v44 = vsub.f32 %v594_v19, %v647_v2  ;;  %v650_v36 = vsub.f32 %v633_v6, %v647_v2  ;;  %v651_v0 = vsub.f32 %v635_v48, %v647_v2  ;;  %v640_v5 = vld [vmem:[%s1865_s5] sm:$0xff] }
 0x315   :  { %v652_v32 = vmul.f32 %v648_v22, %v648_v22  ;;  %v653_v38 = vmul.f32 %v649_v44, %v649_v44  ;;  %v654_v24 = vmul.f32 %v650_v36, %v650_v36  ;;  %v655_v10 = vmul.f32 %v651_v0, %v651_v0 }
 0x317   :  { %v656_v4 = vadd.f32 %v653_v38, %v652_v32 }
 0x319   :  { %v657_v16 = vadd.f32 %v656_v4, %v654_v24 }
 0x31b   :  { %v658_v33 = vadd.f32 %v657_v16, %v655_v10 }
 0x31d   :  { %659 = vadd.xlane.f32.xlu1 %v658_v33 }
 0x32e   :  { %676 = vperm.xlu1 %1104, %v641_v61  }
 0x3aa   :  { %v660_v37 = vpop.xlane.xlu1 %659 }
 0x3ab   :  { %v661_v57 = vmul.f32 0.001953125, %v660_v37 }
 0x3ad   :  { %v662_v39 = vadd.f32 1e-05, %v661_v57 }
 0x3ae   :  { %v677_v3 = vpop.permute.xlu1 %676 }
 0x3af   :  { %1105 = vrsqrt.f32 %v662_v39 }
 0x3b9   :  { %v1106_v6 = vpop.eup %1105 }
 0x3ba   :  { %v664_v19 = vmul.f32 %v1106_v6, %v640_v5 }
 0x3bc   :  { %667 = vperm.xlu0 %1103, %v664_v19  }
 0x43b   :  { %v668_v48 = vpop.permute.xlu0 %667 }
 0x43c   :  { %v670_v53 = vmul.f32 %v668_v48, %v648_v22  ;;  %v671_v58 = vmul.f32 %v668_v48, %v649_v44  ;;  %v672_v54 = vmul.f32 %v668_v48, %v650_v36  ;;  %v673_v38 = vmul.f32 %v668_v48, %v651_v0 }
 0x43e   :  { %v679_v60 = vadd.f32 %v677_v3, %v670_v53  ;;  %v681_v59 = vadd.f32 %v677_v3, %v672_v54  ;;  %v680_v47 = vadd.f32 %v677_v3, %v671_v58  ;;  %v682_v22 = vadd.f32 %v677_v3, %v673_v38 }
 0x440   :  { %v1656_v2 = vmax.f32 %v679_v60, 0.0  ;;  %v1658_v32 = vmax.f32 %v681_v59, 0.0  ;;  %v1664_v24 = vmax.f32 %v680_v47, 0.0  ;;  %v1674_v44 = vmax.f32 %v682_v22, 0.0 }
 0x442   :  { %691 = vrot.lane.b32.xlu0 %v1658_v32, %s1111_s2  ;;  %687 = vrot.lane.b32.xlu1 %v1656_v2, %s1111_s2 }
 0x446   :  { %727 = vrot.lane.b32.xlu0 %v1656_v2, %s1113_s11  ;;  %689 = vrot.lane.b32.xlu1 %v1664_v24, %s1111_s2 }
 0x44a   :  { %747 = vrot.lane.b32.xlu0 %v1656_v2, %s1112_s0  ;;  %707 = vrot.lane.b32.xlu1 %v1656_v2, %s1110_s1 }
 0x44e   :  { %733 = vrot.lane.b32.xlu0 %v1674_v44, %s1113_s11  ;;  %709 = vrot.lane.b32.xlu1 %v1664_v24, %s1110_s1 }
 0x452   :  { %731 = vrot.lane.b32.xlu0 %v1658_v32, %s1113_s11  ;;  %693 = vrot.lane.b32.xlu1 %v1674_v44, %s1111_s2 }
 0x456   :  { %777 = vrot.lane.b32.xlu0 %v1664_v24, %s1114_s12  ;;  %713 = vrot.lane.b32.xlu1 %v1674_v44, %s1110_s1 }
 0x45a   :  { %775 = vrot.lane.b32.xlu0 %v1656_v2, %s1114_s12  ;;  %711 = vrot.lane.b32.xlu1 %v1658_v32, %s1110_s1 }
 0x45e   :  { %797 = vrot.lane.b32.xlu0 %v1664_v24, %s1115_s13  ;;  %729 = vrot.lane.b32.xlu1 %v1664_v24, %s1113_s11 }
 0x462   :  { %817 = vrot.lane.b32.xlu0 %v1664_v24, %s1116_s14  ;;  %749 = vrot.lane.b32.xlu1 %v1664_v24, %s1112_s0 }
 0x466   :  { %795 = vrot.lane.b32.xlu0 %v1656_v2, %s1115_s13  ;;  %753 = vrot.lane.b32.xlu1 %v1674_v44, %s1112_s0 }
 0x46a   :  { %801 = vrot.lane.b32.xlu0 %v1674_v44, %s1115_s13  ;;  %751 = vrot.lane.b32.xlu1 %v1658_v32, %s1112_s0 }
 0x46e   :  { %835 = vrot.lane.b32.xlu0 %v1656_v2, %s1117_s15  ;;  %779 = vrot.lane.b32.xlu1 %v1658_v32, %s1114_s12 }
 0x472   :  { %839 = vrot.lane.b32.xlu0 %v1658_v32, %s1117_s15  ;;  %781 = vrot.lane.b32.xlu1 %v1674_v44, %s1114_s12 }
 0x476   :  { %799 = vrot.lane.b32.xlu1 %v1658_v32, %s1115_s13 }
 0x47a   :  { %819 = vrot.lane.b32.xlu1 %v1658_v32, %s1116_s14 }
 0x47e   :  { %815 = vrot.lane.b32.xlu1 %v1656_v2, %s1116_s14 }
 0x482   :  { %821 = vrot.lane.b32.xlu1 %v1674_v44, %s1116_s14 }
 0x486   :  { %837 = vrot.lane.b32.xlu1 %v1664_v24, %s1117_s15 }
 0x48a   :  { %841 = vrot.lane.b32.xlu1 %v1674_v44, %s1117_s15 }
 0x4b4   :  { %v692_v36 = vpop.permute.xlu0 %691  ;;  %v688_v0 = vpop.permute.xlu1 %687 }
 0x4b8   :  { %v728_v4 = vpop.permute.xlu0 %727  ;;  %v690_v10 = vpop.permute.xlu1 %689 }
 0x4b9   :  { %v697_v61 = vsel %vm172_vm1, %v688_v0, %v690_v10 }
 0x4ba   :  { %v700_v39 = vmul.f32 %v697_v61, %v1431_v27  ;;  %v696_v27 = vsel %vm172_vm1, %v690_v10, %v692_v36 }
 0x4bc   :  { %v748_v16 = vpop.permute.xlu0 %747  ;;  %v708_v33 = vpop.permute.xlu1 %707 }
 0x4c0   :  { %v710_v37 = vpop.permute.xlu1 %709  ;;  %v734_v5 = vpop.permute.xlu0 %733 }
 0x4c1   :  { %v717_v57 = vsel %vm209_vm2, %v708_v33, %v710_v37 }
 0x4c2   :  { %v720_v6 = vmul.f32 %v717_v57, %v1434_v28 }
 0x4c4   :  { %v694_v19 = vpop.permute.xlu1 %693  ;;  %v893_v48 = vpack.c.bf16 %v720_v6, %v700_v39  ;;  %v732_v53 = vpop.permute.xlu0 %731 }
 0x4c5   :  { %v698_v3 = vsel %vm172_vm1, %v694_v19, %v688_v0  ;;  %v695_v28 = vsel %vm172_vm1, %v692_v36, %v694_v19 }
 0x4c6   :  { %927 = vmatprep.subr.bf16.mxu1 %v893_v48  ;;  %v699_v60 = vmul.f32 %v698_v3, %v1412_v21  ;;  %v702_v21 = vmul.f32 %v695_v28, %v1336_v55 }
 0x4c8   :  { %v714_v58 = vpop.permute.xlu1 %713  ;;  %v778_v61 = vpop.permute.xlu0 %777 }
 0x4c9   :  { %v718_v54 = vsel %vm209_vm2, %v714_v58, %v708_v33  ;;  %v701_v33 = vmul.f32 %v696_v27, %v1428_v26 }
 0x4ca   :  { %v719_v59 = vmul.f32 %v718_v54, %v1403_v17 }
 0x4cc   :  { %v892_v47 = vpack.c.bf16 %v719_v59, %v699_v60  ;;  %v712_v38 = vpop.permute.xlu1 %711  ;;  %v776_v19 = vpop.permute.xlu0 %775  ;;  %v735_v60 = vsel %vm246_vm4, %v732_v53, %v734_v5 }
 0x4cd   :  { %v715_v22 = vsel %vm209_vm2, %v712_v38, %v714_v58  ;;  %v716_v0 = vsel %vm209_vm2, %v710_v37, %v712_v38 }
 0x4ce   :  { %v721_v17 = vmul.f32 %v716_v0, %v1425_v25  ;;  %v722_v10 = vmul.f32 %v715_v22, %v1340_v56  ;;  %928 = vmatpush1.bf16.msra.mxu1 %v892_v47  ;;  %v738_v56 = vsel %vm246_vm4, %v734_v5, %v728_v4 }
 0x4cf   :  { %v739_v54 = vmul.f32 %v738_v56, %v1437_v29 }
 0x4d0   :  { %v894_v57 = vpack.c.bf16 %v721_v17, %v701_v33  ;;  %v730_v36 = vpop.permute.xlu1 %729  ;;  %v895_v39 = vpack.c.bf16 %v722_v10, %v702_v21  ;;  %v798_v59 = vpop.permute.xlu0 %797 }
 0x4d1   :  { %v737_v6 = vsel %vm246_vm4, %v728_v4, %v730_v36  ;;  %v742_v4 = vmul.f32 %v735_v60, %v1390_v13 }
 0x4d2   :  { %968 = vmatprep.subr.bf16.mxu0 %v895_v39  ;;  %v740_v55 = vmul.f32 %v737_v6, %v1479_v18  ;;  %v736_v18 = vsel %vm246_vm4, %v730_v36, %v732_v53 }
 0x4d3   :  { %969 = vmatpush1.bf16.msra.mxu0 %v894_v57  ;;  %v741_v5 = vmul.f32 %v736_v18, %v1490_v51  ;;  %v768_v51 = vmul.f32 %v1664_v24, %v1393_v14 }
 0x4d4   :  { %v750_v37 = vpop.permute.xlu1 %749  ;;  %v818_v53 = vpop.permute.xlu0 %817 }
 0x4d5   :  { %v757_v26 = vsel %vm283_vm3, %v748_v16, %v750_v37 }
 0x4d6   :  { %v760_v25 = vmul.f32 %v757_v26, %v1497_v45 }
 0x4d8   :  { %v754_v48 = vpop.permute.xlu1 %753  ;;  %v897_v3 = vpack.c.bf16 %v760_v25, %v740_v55 }
 0x4d9   :  { %v758_v58 = vsel %vm283_vm3, %v754_v48, %v748_v16  ;;  %v785_v16 = vsel %vm344_vm5, %v776_v19, %v778_v61 }
 0x4da   :  { %v759_v27 = vmul.f32 %v758_v58, %v1440_v30  ;;  %929 = vmatprep.subr.bf16.mxu1 %v897_v3  ;;  %v787_v33 = vmul.f32 %v785_v16, %v1515_v42 }
 0x4dc   :  { %v896_v45 = vpack.c.bf16 %v759_v27, %v739_v54  ;;  %v752_v28 = vpop.permute.xlu1 %751 }
 0x4dd   :  { %v755_v47 = vsel %vm283_vm3, %v752_v28, %v754_v48  ;;  %v756_v29 = vsel %vm283_vm3, %v750_v37, %v752_v28 }
 0x4de   :  { %v761_v30 = vmul.f32 %v756_v29, %v1500_v49  ;;  %v762_v38 = vmul.f32 %v755_v47, %v1396_v15  ;;  %930 = vmatpush1.bf16.msra.mxu1 %v896_v45  ;;  %v767_v49 = vmul.f32 %v1656_v2, %v1385_v12  ;;  %v770_v12 = vmul.f32 %v1674_v44, %v1382_v11 }
 0x4e0   :  { %v898_v22 = vpack.c.bf16 %v761_v30, %v741_v5  ;;  %v780_v0 = vpop.permute.xlu1 %779  ;;  %v899_v13 = vpack.c.bf16 %v762_v38, %v742_v4  ;;  %v900_v57 = vpack.c.bf16 %v787_v33, %v767_v49 }
 0x4e1   :  { %v784_v21 = vsel %vm344_vm5, %v778_v61, %v780_v0  ;;  %v796_v61 = vpop.permute.xlu0 %795 }
 0x4e2   :  { %v788_v17 = vmul.f32 %v784_v21, %v1518_v62  ;;  %970 = vmatprep.subr.bf16.mxu0 %v899_v13  ;;  %v769_v62 = vmul.f32 %v1658_v32, %v1370_v7  ;;  %v805_v11 = vsel %vm381_vm6, %v796_v61, %v798_v59 }
 0x4e3   :  { %971 = vmatpush1.bf16.msra.mxu0 %v898_v22  ;;  %v807_v25 = vmul.f32 %v805_v11, %v1566_v9 }
 0x4e4   :  { %v782_v15 = vpop.permute.xlu1 %781  ;;  %v901_v10 = vpack.c.bf16 %v788_v17, %v768_v51 }
 0x4e5   :  { %v783_v36 = vsel %vm344_vm5, %v780_v0, %v782_v15  ;;  %v786_v42 = vsel %vm344_vm5, %v782_v15, %v776_v19  ;;  %v802_v37 = vpop.permute.xlu0 %801 }
 0x4e6   :  { %v789_v39 = vmul.f32 %v783_v36, %v1472_v1  ;;  %v790_v14 = vmul.f32 %v786_v42, %v1475_v40  ;;  %931 = vmatprep.subr.bf16.mxu1 %v901_v10  ;;  %v806_v3 = vsel %vm381_vm6, %v802_v37, %v796_v61 }
 0x4e7   :  { %932 = vmatpush1.bf16.msra.mxu1 %v900_v57  ;;  %v810_v9 = vmul.f32 %v806_v3, %v1540_v34 }
 0x4e8   :  { %v902_v2 = vpack.c.bf16 %v789_v39, %v769_v62  ;;  %v800_v24 = vpop.permute.xlu1 %799  ;;  %v903_v6 = vpack.c.bf16 %v790_v14, %v770_v12 }
 0x4e9   :  { %v804_v19 = vsel %vm381_vm6, %v798_v59, %v800_v24  ;;  %v836_v56 = vpop.permute.xlu0 %835 }
 0x4ea   :  { %972 = vmatprep.subr.bf16.mxu0 %v903_v6  ;;  %v808_v1 = vmul.f32 %v804_v19, %v1569_v20  ;;  %v803_v20 = vsel %vm381_vm6, %v800_v24, %v802_v37 }
 0x4eb   :  { %973 = vmatpush1.bf16.msra.mxu0 %v902_v2  ;;  %v809_v59 = vmul.f32 %v803_v20, %v1537_v8 }
 0x4ec   :  { %v820_v26 = vpop.permute.xlu1 %819 }
 0x4ed   :  { %v824_v7 = vsel %vm418_vm7, %v818_v53, %v820_v26  ;;  %v840_v18 = vpop.permute.xlu0 %839 }
 0x4ee   :  { %v828_v40 = vmul.f32 %v824_v7, %v1578_v23  ;;  %v1010_v7 = vld [vmem:[%s1867_s9] sm:$0xff] }
 0x4f0   :  { %v816_v32 = vpop.permute.xlu1 %815  ;;  %v905_v44 = vpack.c.bf16 %v828_v40, %v808_v1 }
 0x4f1   :  { %v825_v55 = vsel %vm418_vm7, %v816_v32, %v818_v53 }
 0x4f2   :  { %v827_v48 = vmul.f32 %v825_v55, %v1575_v31  ;;  %933 = vmatprep.subr.bf16.mxu1 %v905_v44 }
 0x4f4   :  { %v904_v23 = vpack.c.bf16 %v827_v48, %v807_v25  ;;  %v822_v58 = vpop.permute.xlu1 %821 }
 0x4f5   :  { %v823_v54 = vsel %vm418_vm7, %v820_v26, %v822_v58  ;;  %v826_v60 = vsel %vm418_vm7, %v822_v58, %v816_v32  ;;  %v1009_v32 = vld [vmem:[%s1868_s8] sm:$0xff] }
 0x4f6   :  { %v829_v31 = vmul.f32 %v823_v54, %v1543_v41  ;;  %v830_v27 = vmul.f32 %v826_v60, %v1546_v63  ;;  %934 = vmatpush1.bf16.msra.mxu1 %v904_v23 }
 0x4f8   :  { %v906_v45 = vpack.c.bf16 %v829_v31, %v809_v59  ;;  %v838_v28 = vpop.permute.xlu1 %837  ;;  %v907_v4 = vpack.c.bf16 %v830_v27, %v810_v9 }
 0x4f9   :  { %v844_v47 = vsel %vm455_vm8, %v838_v28, %v840_v18  ;;  %v845_v29 = vsel %vm455_vm8, %v836_v56, %v838_v28 }
 0x4fa   :  { %v847_v16 = vmul.f32 %v1599_v35, %v845_v29  ;;  %v848_v34 = vmul.f32 %v1622_v52, %v844_v47  ;;  %974 = vmatprep.subr.bf16.mxu0 %v907_v4  ;;  %v855_v52 = vld [vmem:[%s1866_s7] sm:$0xf] }
 0x4fb   :  { %975 = vmatpush1.bf16.msra.mxu0 %v906_v45 }
 0x4fc   :  { %v908_v8 = vpack.c.bf16 %v847_v16, %v847_v16  ;;  %v909_v41 = vpack.c.bf16 %v848_v34, %v848_v34  ;;  %v842_v63 = vpop.permute.xlu1 %841 }
 0x4fd   :  { %v843_v5 = vsel %vm455_vm8, %v840_v18, %v842_v63  ;;  %v846_v30 = vsel %vm455_vm8, %v842_v63, %v836_v56 }
 0x4fe   :  { %v849_v38 = vmul.f32 %v1627_v50, %v843_v5  ;;  %v850_v53 = vmul.f32 %v1617_v43, %v846_v30  ;;  %1073 = vmatprep.subr.msk.bf16.mxu1 %vm545_vm9, %v909_v41  ;;  %v916_v35 = vsel %vm545_vm9, %v908_v8, 0 }
 0x4ff   :  { %936 = vmatpush1.bf16.msra.mxu1 %v916_v35 }
 0x500   :  { %v910_v22 = vpack.c.bf16 %v849_v38, %v849_v38  ;;  %v911_v0 = vpack.c.bf16 %v850_v53, %v850_v53 }
 0x502   :  { %1074 = vmatmul.mubr.msk.bf16.vlgmr.msra.gmra.mrb[4].mxu1 %vm541_vm10, %v855_v52  ;;  %1075 = vmatprep.subr.msk.bf16.mxu0 %vm545_vm9, %v911_v0  ;;  %v922_v46 = vsel %vm545_vm9, %v910_v22, 0 }
 0x503   :  { %977 = vmatpush1.bf16.msra.mxu0 %v922_v46 }
 0x506   :  { %1076 = vmatmul.mubr.msk.bf16.vlgmr.msra.gmra.mrb[8].mxu0 %vm541_vm10, %v855_v52 }
 0x5d5   :  { %v961_v43 = vpop.f32.mrb[4].mxu1 }
 0x5d6   :  { %v963_v50 = vpop.f32.mrb[5].mxu1 }
 0x5d7   :  { %v1011_v13 = vadd.f32 %v963_v50, %v961_v43  ;;  %v965_v33 = vpop.f32.mrb[6].mxu1 }
 0x5d8   :  { %v966_v21 = vpop.f32.mrb[7].mxu1 }
 0x5d9   :  { %v1002_v17 = vpop.f32.mrb[8].mxu0 }
 0x5da   :  { %v1012_v51 = vadd.f32 %v1011_v13, %v1002_v17  ;;  %v1004_v49 = vpop.f32.mrb[9].mxu0 }
 0x5db   :  { %v1006_v15 = vpop.f32.mrb[10].mxu0 }
 0x5dc   :  { %v1007_v10 = vpop.f32.mrb[11].mxu0  ;;  %v1013_v57 = vadd.f32 %v1012_v51, %v1004_v49 }
 0x5de   :  { %1014 = vadd.xlane.f32.xlu0 %v1013_v57 }
 0x66b   :  { %v1015_v36 = vpop.xlane.xlu0 %1014 }
 0x66c   :  { %v1016_v42 = vmul.f32 0.001953125, %v1015_v36 }
 0x66e   :  { %v1017_v61 = vsub.f32 %v961_v43, %v1016_v42  ;;  %v1018_v62 = vsub.f32 %v963_v50, %v1016_v42  ;;  %v1019_v39 = vsub.f32 %v1002_v17, %v1016_v42  ;;  %v1020_v14 = vsub.f32 %v1004_v49, %v1016_v42 }
 0x670   :  { %v1021_v12 = vmul.f32 %v1017_v61, %v1017_v61  ;;  %v1022_v2 = vmul.f32 %v1018_v62, %v1018_v62  ;;  %v1023_v24 = vmul.f32 %v1019_v39, %v1019_v39  ;;  %v1024_v19 = vmul.f32 %v1020_v14, %v1020_v14 }
 0x672   :  { %v1025_v6 = vadd.f32 %v1022_v2, %v1021_v12 }
 0x674   :  { %v1026_v37 = vadd.f32 %v1025_v6, %v1023_v24 }
 0x676   :  { %v1027_v26 = vadd.f32 %v1026_v37, %v1024_v19 }
 0x678   :  { %1028 = vadd.xlane.f32.xlu1 %v1027_v26 }
 0x689   :  { %1045 = vperm.xlu1 %1104, %v1010_v7  }
 0x705   :  { %v1029_v1 = vpop.xlane.xlu1 %1028 }
 0x706   :  { %v1030_v40 = vmul.f32 0.001953125, %v1029_v1 }
 0x708   :  { %v1031_v11 = vadd.f32 1e-05, %v1030_v40 }
 0x709   :  { %v1046_v23 = vpop.permute.xlu1 %1045 }
 0x70a   :  { %1107 = vrsqrt.f32 %v1031_v11 }
 0x714   :  { %v1108_v44 = vpop.eup %1107 }
 0x715   :  { %v1033_v55 = vmul.f32 %v1108_v44, %v1009_v32 }
 0x717   :  { %1036 = vperm.xlu0 %1103, %v1033_v55  }
 0x796   :  { %v1037_v25 = vpop.permute.xlu0 %1036 }
 0x797   :  { %v1039_v56 = vmul.f32 %v1037_v25, %v1017_v61  ;;  %v1040_v48 = vmul.f32 %v1037_v25, %v1018_v62  ;;  %v1041_v3 = vmul.f32 %v1037_v25, %v1019_v39  ;;  %v1042_v20 = vmul.f32 %v1037_v25, %v1020_v14 }
 0x799   :  { %v1048_v58 = vadd.f32 %v1046_v23, %v1039_v56  ;;  %v1049_v54 = vadd.f32 %v1046_v23, %v1040_v48  ;;  %v1050_v60 = vadd.f32 %v1046_v23, %v1041_v3  ;;  %v1051_v9 = vadd.f32 %v1046_v23, %v1042_v20 }
 0x79b   :  { %v1052_v59 = vmax.f32 %v1048_v58, 0.0  ;;  %v1053_v31 = vmax.f32 %v1049_v54, 0.0  ;;  %v1054_v27 = vmax.f32 %v1050_v60, 0.0  ;;  %v1055_v18 = vmax.f32 %v1051_v9, 0.0 }
 0x79d   :  { %1056 = vst [vmem:[%s1869_s10] sm:$0xff] %v1052_v59  ;;  %1057 = vst [vmem:[%s1869_s10 + $0x8] sm:$0xff] %v1053_v31 }
 0x79e   :  { %1058 = vst [vmem:[%s1869_s10 + $0x10] sm:$0xff] %v1054_v27  ;;  %1059 = vst [vmem:[%s1869_s10 + $0x18] sm:$0xff] %v1055_v18 }

</bundles_post_ra>
